<compile_context>
chip_gen: v7x
topology: tpu7x:2x2x1
jax: 0.10.0
libtpu: 0.0.40
codegen_flags: <defaults>
</compile_context>

<pallas_src>
import functools
import numpy as np
import jax
import jax.numpy as jnp
from jax.experimental import pallas as pl
from jax.experimental.pallas import tpu as pltpu


# ----------------------------------------------------------------------------- operators
def _adaptive_avg_matrix(out_size, in_size):
    # A[o, i] = 1/(end-start) for start <= i < end, matching PyTorch's
    # adaptive_avg_pool / F.interpolate(mode='area') index rule.
    A = np.zeros((out_size, in_size), dtype=np.float32)
    for o in range(out_size):
        start = (o * in_size) // out_size
        end = -((-(o + 1) * in_size) // out_size)  # ceil((o+1)*I/O)
        A[o, start:end] = 1.0 / (end - start)
    return A


@functools.lru_cache(maxsize=None)
def _axis_operator(out_size, in_size):
    """(O, I) per-axis pooling operator, device resident."""
    return jnp.asarray(_adaptive_avg_matrix(out_size, in_size))


@functools.lru_cache(maxsize=None)
def _axis_operator_t(out_size, in_size):
    """(I, O) transposed per-axis pooling operator, device resident."""
    return jnp.asarray(_adaptive_avg_matrix(out_size, in_size).T)


@functools.lru_cache(maxsize=None)
def _hw_operator(oh, h, ow, w):
    """Kron(Ah, Aw)^T with shape (H*W, OH*OW): flattened (h, w) -> flattened (oh, ow)."""
    a = np.kron(_adaptive_avg_matrix(oh, h), _adaptive_avg_matrix(ow, w))  # (OH*OW, H*W)
    return jnp.asarray(a.T)


# ----------------------------------------------------------------------------- fused path
def _fused_kernel(tb, x_ref, ahw_ref, ad_ref, o_ref):
    # x_ref: (TB, D, H*W)   ahw_ref: (H*W, OH*OW)   ad_ref: (OD, D)   o_ref: (TB, OD, OH*OW)
    ahw = ahw_ref[...]
    ad = ad_ref[...]
    for b in range(tb):  # static unroll over the small batch tile
        t = jnp.dot(x_ref[b], ahw, preferred_element_type=jnp.float32)          # (D, OH*OW)
        o_ref[b] = jnp.dot(ad, t, preferred_element_type=jnp.float32).astype(o_ref.dtype)


def _pick_batch_tile(b, per_batch_bytes, budget_bytes=2 << 20, max_unroll=8):
    cap = max(1, budget_bytes // max(per_batch_bytes, 1))
    cap = min(cap, max_unroll, b)
    if b >= 2:
        cap = min(cap, max(1, b // 2))  # keep >= 2 grid steps for pipelining / megacore
    for t in range(cap, 0, -1):
        if b % t == 0:
            return t
    return 1


def _ada_unpool3d_fused(x, od, oh, ow):
    N, C, D, H, W = x.shape
    B = N * C
    HW, OHW = H * W, oh * ow

    ahw = _hw_operator(oh, H, ow, W)      # (HW, OHW)
    ad = _axis_operator(od, D)            # (OD, D)

    x3 = x.reshape(B, D, HW)              # contiguous reshape, free
    tb = _pick_batch_tile(B, (D * HW + od * OHW) * 4)

    out = pl.pallas_call(
        functools.partial(_fused_kernel, tb),
        out_shape=jax.ShapeDtypeStruct((B, od, OHW), x.dtype),
        grid=(B // tb,),
        in_specs=[
            pl.BlockSpec((tb, D, HW), lambda i: (i, 0, 0)),
            pl.BlockSpec((HW, OHW), lambda i: (0, 0)),
            pl.BlockSpec((od, D), lambda i: (0, 0)),
        ],
        out_specs=pl.BlockSpec((tb, od, OHW), lambda i: (i, 0, 0)),
        compiler_params=pltpu.CompilerParams(dimension_semantics=("parallel",)),
    )(x3, ahw, ad)
    return out.reshape(N, C, od, oh, ow)


# ------------------------------------------------------------------- separable fallback path
def _rowmat_kernel(x_ref, b_ref, o_ref):
    # x_ref: (TM, K)   b_ref: (K, Ncols)   o_ref: (TM, Ncols)
    o_ref[...] = jnp.dot(
        x_ref[...], b_ref[...], preferred_element_type=jnp.float32
    ).astype(o_ref.dtype)


def _pick_row_tile(m, max_tile=1024):
    """Largest multiple-of-8 divisor of m that fits max_tile; full m if m is small."""
    if m <= max_tile:
        return m
    for t in range(max_tile - (max_tile % 8), 7, -8):
        if m % t == 0:
            return t
    return m


def _rowmat(x2d, op_t):
    """(M, K) @ (K, Ncols) row-tiled Pallas matmul; tiny operator stays VMEM-resident."""
    M, K = x2d.shape
    _, n = op_t.shape
    tm = _pick_row_tile(M)
    return pl.pallas_call(
        _rowmat_kernel,
        out_shape=jax.ShapeDtypeStruct((M, n), x2d.dtype),
        grid=(M // tm,),
        in_specs=[
            pl.BlockSpec((tm, K), lambda i: (i, 0)),
            pl.BlockSpec((K, n), lambda i: (0, 0)),
        ],
        out_specs=pl.BlockSpec((tm, n), lambda i: (i, 0)),
        compiler_params=pltpu.CompilerParams(dimension_semantics=("parallel",)),
    )(x2d, op_t)


def _ada_unpool3d_separable(x, od, oh, ow):
    N, C, D, H, W = x.shape
    aw_t = _axis_operator_t(ow, W)  # (W, OW)
    ah_t = _axis_operator_t(oh, H)  # (H, OH)
    ad_t = _axis_operator_t(od, D)  # (D, OD)
    t = _rowmat(x.reshape(N * C * D * H, W), aw_t)
    t = t.reshape(N, C, D, H, ow).transpose(0, 1, 2, 4, 3).reshape(N * C * D * ow, H)
    t = _rowmat(t, ah_t)
    t = t.reshape(N, C, D, ow, oh).transpose(0, 1, 3, 4, 2).reshape(N * C * ow * oh, D)
    t = _rowmat(t, ad_t)
    return t.reshape(N, C, ow, oh, od).transpose(0, 1, 4, 3, 2)


# ----------------------------------------------------------------------------- public entry
_FUSED_OP_BYTES_LIMIT = 8 << 20   # HW-Kron operator budget
_FUSED_SLAB_BYTES_LIMIT = 4 << 20  # per-batch input / output slab budget


def ada_unpool3d(x, mask):
    """x: (N, C, D, H, W); mask: (N, OD, OH, OW). Returns (N, C, OD, OH, OW)."""
    assert mask is not None, "`mask` cannot be `None`!"
    N, C, D, H, W = x.shape
    OD, OH, OW = mask.shape[1:]

    # clamp(mask) and y*m + y*(1-m) are the identity on y, so the mask never enters
    # the kernels (its shape only selects the interpolation target size).
    use_fused = (
        H * W * OH * OW * 4 <= _FUSED_OP_BYTES_LIMIT
        and D * H * W * 4 <= _FUSED_SLAB_BYTES_LIMIT
        and OD * OH * OW * 4 <= _FUSED_SLAB_BYTES_LIMIT
    )
    if use_fused:
        return _ada_unpool3d_fused(x, OD, OH, OW)
    return _ada_unpool3d_separable(x, OD, OH, OW)


ada_unpool3d_jit = jax.jit(ada_unpool3d)
_ada_unpool3d_separable_jit = jax.jit(_ada_unpool3d_separable, static_argnums=(1, 2, 3))


if __name__ == "__main__":
    # Small shapes consistent with a 3D unpool: upsample (4, 8, 8) -> (8, 16, 16).
    N, C, D, H, W = 2, 4, 4, 8, 8
    OD, OH, OW = 8, 16, 16

    key = jax.random.PRNGKey(0)
    kx, km = jax.random.split(key)
    x = jax.random.normal(kx, (N, C, D, H, W), dtype=jnp.float32)
    # Mask values outside [0,1] so the (identity) clamp/blend path is exercised by the ref.
    mask = jax.random.uniform(km, (N, OD, OH, OW), dtype=jnp.float32,
                              minval=-0.5, maxval=1.5)

    out = ada_unpool3d_jit(x, mask)
    out = jax.block_until_ready(out)

    # Pure-JAX reference with the full original semantics (area interp + mask blend).
    Ad = jnp.asarray(_adaptive_avg_matrix(OD, D))
    Ah = jnp.asarray(_adaptive_avg_matrix(OH, H))
    Aw = jnp.asarray(_adaptive_avg_matrix(OW, W))
    y_ref = jnp.einsum("nkdhw,ad,bh,ew->nkabe", x, Ad, Ah, Aw)
    m_ref = jnp.clip(mask, 0.0, 1.0)[:, None]
    ref = y_ref * m_ref + y_ref * (1.0 - m_ref)

    assert out.shape == (N, C, OD, OH, OW)
    np.testing.assert_allclose(np.asarray(out), np.asarray(ref), rtol=1e-4, atol=1e-4)

    # Also exercise the separable fallback path (used for large spatial shapes).
    out_sep = jax.block_until_ready(_ada_unpool3d_separable_jit(x, OD, OH, OW))
    np.testing.assert_allclose(np.asarray(out_sep), np.asarray(ref), rtol=1e-4, atol=1e-4)

    # TODO(synk): tuple-mask branch of adaunpool (two masks + blend weight) and the
    # interpolate=False branch are not implemented; the module's default path uses a
    # single mask tensor with interpolate=True.
    print("KERNEL_OK")
</pallas_src>

<mosaic_0001>
module attributes {stable_mosaic.version = 11 : i64} {
  func.func @_fused_kernel(%arg0: i32, %arg1: memref<4x4x64xf32, #tpu.memory_space<vmem>>, %arg2: memref<64x256xf32, #tpu.memory_space<vmem>>, %arg3: memref<8x4xf32, #tpu.memory_space<vmem>>, %arg4: memref<4x8x256xf32, #tpu.memory_space<vmem>>) attributes {dimension_semantics = [#tpu.dimension_semantics<parallel>], iteration_bounds = array<i64: 2>, scalar_prefetch = 0 : i64, scratch_operands = 0 : i64, tpu.core_type = #tpu.core_type<tc>, window_params = [{transform_indices = @transform_0, window_bounds = array<i64: 4, 4, 64>}, {pipeline_mode = #tpu.pipeline_mode<synchronous>, transform_indices = @transform_1, window_bounds = array<i64: 64, 256>}, {pipeline_mode = #tpu.pipeline_mode<synchronous>, transform_indices = @transform_2, window_bounds = array<i64: 8, 4>}, {transform_indices = @transform_3, window_bounds = array<i64: 4, 8, 256>}]} {
    %c0 = arith.constant 0 : index
    %c0_0 = arith.constant 0 : index
    %0 = vector.load %arg2[%c0, %c0_0] : memref<64x256xf32, #tpu.memory_space<vmem>>, vector<64x256xf32>
    %c0_1 = arith.constant 0 : index
    %c0_2 = arith.constant 0 : index
    %1 = vector.load %arg3[%c0_1, %c0_2] : memref<8x4xf32, #tpu.memory_space<vmem>>, vector<8x4xf32>
    %c0_3 = arith.constant 0 : index
    %c0_4 = arith.constant 0 : index
    %c0_5 = arith.constant 0 : index
    %2 = vector.load %arg1[%c0_3, %c0_4, %c0_5] : memref<4x4x64xf32, #tpu.memory_space<vmem>>, vector<1x4x64xf32>
    %3 = vector.shape_cast %2 : vector<1x4x64xf32> to vector<4x64xf32>
    %cst = arith.constant dense<0.000000e+00> : vector<4x256xf32>
    %4 = tpu.matmul %3, %0, %cst {dimension_numbers = #tpu.dot_dimension_numbers<[1], [0], [0], [1], [0, 0, 1, 1], [], []>} : vector<4x64xf32>, vector<64x256xf32>, vector<4x256xf32> -> vector<4x256xf32>
    %cst_6 = arith.constant dense<0.000000e+00> : vector<8x256xf32>
    %5 = tpu.matmul %1, %4, %cst_6 {dimension_numbers = #tpu.dot_dimension_numbers<[1], [0], [0], [1], [0, 0, 1, 1], [], []>} : vector<8x4xf32>, vector<4x256xf32>, vector<8x256xf32> -> vector<8x256xf32>
    %c0_7 = arith.constant 0 : index
    %c0_8 = arith.constant 0 : index
    %c0_9 = arith.constant 0 : index
    %6 = vector.load %arg4[%c0_7, %c0_8, %c0_9] : memref<4x8x256xf32, #tpu.memory_space<vmem>>, vector<1x8x256xf32>
    %7 = vector.shape_cast %6 : vector<1x8x256xf32> to vector<8x256xf32>
    %8 = vector.shape_cast %5 : vector<8x256xf32> to vector<1x8x256xf32>
    tpu.vector_store %arg4[%c0_7, %c0_8, %c0_9], %8 {strides = array<i32>} : memref<4x8x256xf32, #tpu.memory_space<vmem>>, vector<1x8x256xf32>,
    %c1 = arith.constant 1 : index
    %c0_10 = arith.constant 0 : index
    %c0_11 = arith.constant 0 : index
    %9 = vector.load %arg1[%c1, %c0_10, %c0_11] : memref<4x4x64xf32, #tpu.memory_space<vmem>>, vector<1x4x64xf32>
    %10 = vector.shape_cast %9 : vector<1x4x64xf32> to vector<4x64xf32>
    %cst_12 = arith.constant dense<0.000000e+00> : vector<4x256xf32>
    %11 = tpu.matmul %10, %0, %cst_12 {dimension_numbers = #tpu.dot_dimension_numbers<[1], [0], [0], [1], [0, 0, 1, 1], [], []>} : vector<4x64xf32>, vector<64x256xf32>, vector<4x256xf32> -> vector<4x256xf32>
    %cst_13 = arith.constant dense<0.000000e+00> : vector<8x256xf32>
    %12 = tpu.matmul %1, %11, %cst_13 {dimension_numbers = #tpu.dot_dimension_numbers<[1], [0], [0], [1], [0, 0, 1, 1], [], []>} : vector<8x4xf32>, vector<4x256xf32>, vector<8x256xf32> -> vector<8x256xf32>
    %c1_14 = arith.constant 1 : index
    %c0_15 = arith.constant 0 : index
    %c0_16 = arith.constant 0 : index
    %13 = vector.load %arg4[%c1_14, %c0_15, %c0_16] : memref<4x8x256xf32, #tpu.memory_space<vmem>>, vector<1x8x256xf32>
    %14 = vector.shape_cast %13 : vector<1x8x256xf32> to vector<8x256xf32>
    %15 = vector.shape_cast %12 : vector<8x256xf32> to vector<1x8x256xf32>
    tpu.vector_store %arg4[%c1_14, %c0_15, %c0_16], %15 {strides = array<i32>} : memref<4x8x256xf32, #tpu.memory_space<vmem>>, vector<1x8x256xf32>,
    %c2 = arith.constant 2 : index
    %c0_17 = arith.constant 0 : index
    %c0_18 = arith.constant 0 : index
    %16 = vector.load %arg1[%c2, %c0_17, %c0_18] : memref<4x4x64xf32, #tpu.memory_space<vmem>>, vector<1x4x64xf32>
    %17 = vector.shape_cast %16 : vector<1x4x64xf32> to vector<4x64xf32>
    %cst_19 = arith.constant dense<0.000000e+00> : vector<4x256xf32>
    %18 = tpu.matmul %17, %0, %cst_19 {dimension_numbers = #tpu.dot_dimension_numbers<[1], [0], [0], [1], [0, 0, 1, 1], [], []>} : vector<4x64xf32>, vector<64x256xf32>, vector<4x256xf32> -> vector<4x256xf32>
    %cst_20 = arith.constant dense<0.000000e+00> : vector<8x256xf32>
    %19 = tpu.matmul %1, %18, %cst_20 {dimension_numbers = #tpu.dot_dimension_numbers<[1], [0], [0], [1], [0, 0, 1, 1], [], []>} : vector<8x4xf32>, vector<4x256xf32>, vector<8x256xf32> -> vector<8x256xf32>
    %c2_21 = arith.constant 2 : index
    %c0_22 = arith.constant 0 : index
    %c0_23 = arith.constant 0 : index
    %20 = vector.load %arg4[%c2_21, %c0_22, %c0_23] : memref<4x8x256xf32, #tpu.memory_space<vmem>>, vector<1x8x256xf32>
    %21 = vector.shape_cast %20 : vector<1x8x256xf32> to vector<8x256xf32>
    %22 = vector.shape_cast %19 : vector<8x256xf32> to vector<1x8x256xf32>
    tpu.vector_store %arg4[%c2_21, %c0_22, %c0_23], %22 {strides = array<i32>} : memref<4x8x256xf32, #tpu.memory_space<vmem>>, vector<1x8x256xf32>,
    %c3 = arith.constant 3 : index
    %c0_24 = arith.constant 0 : index
    %c0_25 = arith.constant 0 : index
    %23 = vector.load %arg1[%c3, %c0_24, %c0_25] : memref<4x4x64xf32, #tpu.memory_space<vmem>>, vector<1x4x64xf32>
    %24 = vector.shape_cast %23 : vector<1x4x64xf32> to vector<4x64xf32>
    %cst_26 = arith.constant dense<0.000000e+00> : vector<4x256xf32>
    %25 = tpu.matmul %24, %0, %cst_26 {dimension_numbers = #tpu.dot_dimension_numbers<[1], [0], [0], [1], [0, 0, 1, 1], [], []>} : vector<4x64xf32>, vector<64x256xf32>, vector<4x256xf32> -> vector<4x256xf32>
    %cst_27 = arith.constant dense<0.000000e+00> : vector<8x256xf32>
    %26 = tpu.matmul %1, %25, %cst_27 {dimension_numbers = #tpu.dot_dimension_numbers<[1], [0], [0], [1], [0, 0, 1, 1], [], []>} : vector<8x4xf32>, vector<4x256xf32>, vector<8x256xf32> -> vector<8x256xf32>
    %c3_28 = arith.constant 3 : index
    %c0_29 = arith.constant 0 : index
    %c0_30 = arith.constant 0 : index
    %27 = vector.load %arg4[%c3_28, %c0_29, %c0_30] : memref<4x8x256xf32, #tpu.memory_space<vmem>>, vector<1x8x256xf32>
    %28 = vector.shape_cast %27 : vector<1x8x256xf32> to vector<8x256xf32>
    %29 = vector.shape_cast %26 : vector<8x256xf32> to vector<1x8x256xf32>
    tpu.vector_store %arg4[%c3_28, %c0_29, %c0_30], %29 {strides = array<i32>} : memref<4x8x256xf32, #tpu.memory_space<vmem>>, vector<1x8x256xf32>,
    return
  }
  func.func @transform_0(%arg0: i32) -> (i32, i32, i32) {
    %c0_i32 = arith.constant 0 : i32
    %c0_i32_0 = arith.constant 0 : i32
    %c0_i32_1 = arith.constant 0 : i32
    return %arg0, %c0_i32, %c0_i32_0 : i32, i32, i32
  }
  func.func @transform_1(%arg0: i32) -> (i32, i32) {
    %c0_i32 = arith.constant 0 : i32
    %c0_i32_0 = arith.constant 0 : i32
    %c0_i32_1 = arith.constant 0 : i32
    return %c0_i32, %c0_i32_0 : i32, i32
  }
  func.func @transform_2(%arg0: i32) -> (i32, i32) {
    %c0_i32 = arith.constant 0 : i32
    %c0_i32_0 = arith.constant 0 : i32
    %c0_i32_1 = arith.constant 0 : i32
    return %c0_i32, %c0_i32_0 : i32, i32
  }
  func.func @transform_3(%arg0: i32) -> (i32, i32, i32) {
    %c0_i32 = arith.constant 0 : i32
    %c0_i32_0 = arith.constant 0 : i32
    %c0_i32_1 = arith.constant 0 : i32
    return %arg0, %c0_i32, %c0_i32_0 : i32, i32, i32
  }
}

</mosaic_0001>

<bundles_post_ra>
// kernel: ada_unpool3d.1
= control target key start
LH: loop header
LB: loop body
LE: loop exit
PB: predicated region body
PF: predicated region fallthrough
CT: control target
= control target key end

     0   :  { %s1019_s12 = smov 0   ;;  %s1185_s0 = inlined_call_operand.vmem [shape: f32[8,4,64], index: 0, kind: input, shape index: {}]   ;;  %s1186_s1 = inlined_call_operand.vmem [shape: f32[64,256], index: 1, kind: input, shape index: {}]   ;;  %s1187_s2 = inlined_call_operand.vmem [shape: f32[8,4], index: 2, kind: input, shape index: {}]   ;;  %s1188_s3 = inlined_call_operand.vmem [shape: f32[8,8,256], index: 3, kind: output, shape index: {}]  }
   0x1 LB: > { %s879_s13 = sadd.s32 4294967295, %s996_s12   ;;  %p883_p0 = scmp.ge.s32.totalorder %s996_s12, 1  ;;  %s996_s12 = sphi %s1019_s12, %s13_s12  }
   0x2   : > { %p138_p1 = scmp.lt.s32.totalorder %s996_s12, 3 }
   0x4   : > { %p139_p2 = pnand %p883_p0, %p138_p1 }
   0x5   : > { %v177_v0 = vld [vmem:[%s1186_s1 + $0x8] sm:$0xff] (!%p139_p2)  ;;  %v179_v1 = vld [vmem:[%s1186_s1 + $0x18] sm:$0xff] (!%p139_p2)  ;;  %v176_v2 = vld [vmem:[%s1186_s1] sm:$0xff] (!%p139_p2)  ;;  %s884_s20 = sshll.u32 (!%p139_p2), %s879_s13, 2  ;;  %v998_v7 = vmov (!%p139_p2), 0.0   ;;  %vm194_vm0 = vcmask (!%p139_p2), 523264  }
   0x6   : > { %142 = sbr.rel (%p139_p2) target bundleno = 931 (0x3a3), region = 32  ;;  %v1036_v3 = vpack.c.bf16 (!%p139_p2), %v179_v1, %v177_v0  ;;  %v178_v4 = vld [vmem:[%s1186_s1 + $0x10] sm:$0xff] (!%p139_p2)  ;;  %v181_v5 = vld [vmem:[%s1186_s1 + $0x28] sm:$0xff] (!%p139_p2)  ;;  %v183_v6 = vld [vmem:[%s1186_s1 + $0x38] sm:$0xff] (!%p139_p2)  ;;  %262 = vmatprep.mubr.f32.mxu0 (!%p139_p2), %v998_v7  ;;  %344 = vmatprep.mubr.f32.mxu1 (!%p139_p2), %v998_v7  ;;  %p164_p3 = scmp.lt.s32.totalorder (!%p139_p2), %s884_s20, 7  ;;  %vm273_vm1 = vcmask (!%p139_p2), 1043456  }
   0x7   : > { %v1049_v8 = vpack.c.bf16 (!%p139_p2), %v178_v4, %v176_v2  ;;  %v1051_v9 = vpack.c.bf16 (!%p139_p2), %v183_v6, %v181_v5  ;;  %v180_v10 = vld [vmem:[%s1186_s1 + $0x20] sm:$0xff] (!%p139_p2)  ;;  %v182_v11 = vld [vmem:[%s1186_s1 + $0x30] sm:$0xff] (!%p139_p2)  ;;  %v185_v12 = vld [vmem:[%s1186_s1 + $0x48] sm:$0xff] (!%p139_p2)  ;;  %vm269_vm2 = vcmask (!%p139_p2), 31744  }
   0x8   : > { %918 = vmatprep.subr.bf16.mxu0 (!%p139_p2), %v1036_v3  ;;  %v187_v13 = vld [vmem:[%s1186_s1 + $0x58] sm:$0xff] (!%p139_p2)  ;;  %v1067_v14 = vpack.c.bf16 (!%p139_p2), %v182_v11, %v180_v10  ;;  %v184_v16 = vld [vmem:[%s1186_s1 + $0x40] sm:$0xff] (!%p139_p2)  ;;  %v186_v17 = vld [vmem:[%s1186_s1 + $0x50] sm:$0xff] (!%p139_p2) }
   0x9   : > { %920 = vmatpush1.bf16.msra.mxu0 (!%p139_p2), %v1049_v8  ;;  %v1070_v15 = vpack.c.bf16 (!%p139_p2), %v187_v13, %v185_v12  ;;  %v189_v18 = vld [vmem:[%s1186_s1 + $0x68] sm:$0xff] (!%p139_p2)  ;;  %v191_v19 = vld [vmem:[%s1186_s1 + $0x78] sm:$0xff] (!%p139_p2)  ;;  %v1087_v20 = vpack.c.bf16 (!%p139_p2), %v186_v17, %v184_v16  ;;  %v188_v22 = vld [vmem:[%s1186_s1 + $0x60] sm:$0xff] (!%p139_p2) }
   0xa   : > { %922 = vmatprep.subr.bf16.mxu0 (!%p139_p2), %v1051_v9  ;;  %v1090_v21 = vpack.c.bf16 (!%p139_p2), %v191_v19, %v189_v18  ;;  %v190_v23 = vld [vmem:[%s1186_s1 + $0x70] sm:$0xff] (!%p139_p2)  ;;  %v1115_v28 = vld [vmem:[%s1187_s2] sm:$0xff] (!%p139_p2) }
   0xb   : > { %v1100_v24 = vpack.c.bf16 (!%p139_p2), %v190_v23, %v188_v22 }
   0xd   : > { %s1190_s20 = smov (!%p164_p3, %s884_s20), 7  ;;  %924 = vmatpush1.bf16.msra.mxu0 %v1067_v14 }
   0xe   : > { %926 = vmatprep.subr.bf16.mxu0 %v1070_v15  ;;  %s885_s22 = sshll.u32 %s1190_s20, 2  ;;  %s916_s28 = sshll.u32 %s1190_s20, 4 }
   0xf   : > { %s1106_s25 = scalar_lea.vmem %s1185_s0, %s885_s22  ;;  %s1148_s4 = scalar_lea.vmem %s1188_s3, %s916_s28 }
  0x10   : > { %v193_v25 = vld [vmem:[%s1106_s25] sm:$0xf]  ;;  %v893_v29 = vld [vmem:[%s1106_s25 + $0x4] sm:$0xf]  ;;  %v900_v30 = vld [vmem:[%s1106_s25 + $0x8] sm:$0xf] }
  0x11   : > { %928 = vmatpush1.bf16.msra.mxu0 %v1087_v20  ;;  %v907_v37 = vld [vmem:[%s1106_s25 + $0xc] sm:$0xf] }
  0x12   : > { %930 = vmatprep.subr.bf16.mxu0 %v1090_v21 }
  0x15   : > { %932 = vmatpush1.bf16.msra.mxu0 %v1100_v24 }
  0x18   : > { %889 = vmatmul.mubr.msk.f32.vlgmr.msra.gmra.mrb[0].mxu0 %vm194_vm0, %v193_v25 }
  0x19   : > { %499 = vmatprep.mubr.f32.mxu0 %v998_v7 }
  0xeb   : > { %v264_v26 = vpop.f32.mrb[0].mxu0 }
  0xec   : > { %v266_v27 = vpop.f32.mrb[1].mxu0 }
  0xed   : > { %890 = vmatprep.subr.msk.mxu1 %vm273_vm1, %v266_v27 }
  0xee   : > { %891 = vmatpush1.msk.msra.mxu1 %vm273_vm1, %v264_v26 }
  0xef   : > { %892 = vmatmul.mubr.msk.f32.vlgmr.msra.gmra.mrb[0].mxu1 %vm269_vm2, %v1115_v28  ;;  %934 = vmatprep.subr.bf16.mxu1 %v1036_v3 }
  0xf0   : > { %936 = vmatpush1.bf16.msra.mxu1 %v1049_v8  ;;  %422 = vmatprep.mubr.f32.mxu1 %v998_v7 }
  0xf1   : > { %938 = vmatprep.subr.bf16.mxu1 %v1051_v9 }
  0xf4   : > { %940 = vmatpush1.bf16.msra.mxu1 %v1067_v14 }
  0xf5   : > { %942 = vmatprep.subr.bf16.mxu1 %v1070_v15 }
  0xf8   : > { %944 = vmatpush1.bf16.msra.mxu1 %v1087_v20 }
  0xf9   : > { %946 = vmatprep.subr.bf16.mxu1 %v1090_v21 }
  0xfc   : > { %948 = vmatpush1.bf16.msra.mxu1 %v1100_v24 }
  0xfd   : > { %950 = vmatprep.subr.bf16.mxu1 %v1036_v3 }
  0xff   : > { %894 = vmatmul.mubr.msk.f32.vlgmr.msra.gmra.mrb[2].mxu1 %vm194_vm0, %v893_v29 }
 0x100   : > { %952 = vmatpush1.bf16.msra.mxu1 %v1049_v8  ;;  %578 = vmatprep.mubr.f32.mxu1 %v998_v7 }
 0x101   : > { %954 = vmatprep.subr.bf16.mxu1 %v1051_v9 }
 0x104   : > { %956 = vmatpush1.bf16.msra.mxu1 %v1067_v14 }
 0x105   : > { %958 = vmatprep.subr.bf16.mxu1 %v1070_v15 }
 0x108   : > { %960 = vmatpush1.bf16.msra.mxu1 %v1087_v20 }
 0x109   : > { %962 = vmatprep.subr.bf16.mxu1 %v1090_v21 }
 0x10c   : > { %964 = vmatpush1.bf16.msra.mxu1 %v1100_v24 }
 0x10f   : > { %901 = vmatmul.mubr.msk.f32.vlgmr.msra.gmra.mrb[4].mxu1 %vm194_vm0, %v900_v30 }
 0x110   : > { %811 = vmatprep.mubr.f32.mxu1 %v998_v7 }
 0x1c2   : > { %v346_v31 = vpop.f32.mrb[0].mxu1 }
 0x1c3   : > { %351 = vst [vmem:[%s1148_s4] sm:$0xff] %v346_v31  ;;  %v348_v32 = vpop.f32.mrb[1].mxu1 }
 0x1c4   : > { %352 = vst [vmem:[%s1148_s4 + $0x8] sm:$0xff] %v348_v32 }
 0x1d2   : > { %v424_v33 = vpop.f32.mrb[2].mxu1 }
 0x1d3   : > { %v426_v34 = vpop.f32.mrb[3].mxu1 }
 0x1d4   : > { %895 = vmatprep.subr.msk.mxu0 %vm273_vm1, %v426_v34 }
 0x1d5   : > { %896 = vmatpush1.msk.msra.mxu0 %vm273_vm1, %v424_v33 }
 0x1d6   : > { %897 = vmatmul.mubr.msk.f32.vlgmr.msra.gmra.mrb[2].mxu0 %vm269_vm2, %v1115_v28 }
 0x1d7   : > { %655 = vmatprep.mubr.f32.mxu0 %v998_v7 }
 0x1e2   : > { %v580_v35 = vpop.f32.mrb[4].mxu1 }
 0x1e3   : > { %v582_v36 = vpop.f32.mrb[5].mxu1 }
 0x1e4   : > { %902 = vmatprep.subr.msk.mxu0 %vm273_vm1, %v582_v36 }
 0x1e5   : > { %903 = vmatpush1.msk.msra.mxu0 %vm273_vm1, %v580_v35 }
 0x1e6   : > { %904 = vmatmul.mubr.msk.f32.vlgmr.msra.gmra.mrb[4].mxu0 %vm269_vm2, %v1115_v28  ;;  %966 = vmatprep.subr.bf16.mxu0 %v1036_v3 }
 0x1e7   : > { %968 = vmatpush1.bf16.msra.mxu0 %v1049_v8  ;;  %734 = vmatprep.mubr.f32.mxu0 %v998_v7 }
 0x1e8   : > { %970 = vmatprep.subr.bf16.mxu0 %v1051_v9 }
 0x1eb   : > { %972 = vmatpush1.bf16.msra.mxu0 %v1067_v14 }
 0x1ec   : > { %974 = vmatprep.subr.bf16.mxu0 %v1070_v15 }
 0x1ef   : > { %976 = vmatpush1.bf16.msra.mxu0 %v1087_v20 }
 0x1f0   : > { %978 = vmatprep.subr.bf16.mxu0 %v1090_v21 }
 0x1f3   : > { %980 = vmatpush1.bf16.msra.mxu0 %v1100_v24 }
 0x1f6   : > { %908 = vmatmul.mubr.msk.f32.vlgmr.msra.gmra.mrb[6].mxu0 %vm194_vm0, %v907_v37 }
 0x2a9   : > { %v501_v38 = vpop.f32.mrb[2].mxu0 }
 0x2aa   : > { %898 = vst [vmem:[%s1148_s4 + $0x10] sm:$0xff] %v501_v38  ;;  %v503_v39 = vpop.f32.mrb[3].mxu0 }
 0x2ab   : > { %899 = vst [vmem:[%s1148_s4 + $0x18] sm:$0xff] %v503_v39 }
 0x2b9   : > { %v657_v40 = vpop.f32.mrb[4].mxu0 }
 0x2ba   : > { %905 = vst [vmem:[%s1148_s4 + $0x20] sm:$0xff] %v657_v40  ;;  %v659_v41 = vpop.f32.mrb[5].mxu0 }
 0x2bb   : > { %906 = vst [vmem:[%s1148_s4 + $0x28] sm:$0xff] %v659_v41 }
 0x2c9   : > { %v736_v42 = vpop.f32.mrb[6].mxu0 }
 0x2ca   : > { %v738_v43 = vpop.f32.mrb[7].mxu0 }
 0x2cb   : > { %909 = vmatprep.subr.msk.mxu1 %vm273_vm1, %v738_v43 }
 0x2cc   : > { %910 = vmatpush1.msk.msra.mxu1 %vm273_vm1, %v736_v42 }
 0x2cd   : > { %911 = vmatmul.mubr.msk.f32.vlgmr.msra.gmra.mrb[6].mxu1 %vm269_vm2, %v1115_v28 }
 0x3a0   : > { %v813_v44 = vpop.f32.mrb[6].mxu1 }
 0x3a1   : > { %912 = vst [vmem:[%s1148_s4 + $0x30] sm:$0xff] %v813_v44  ;;  %v815_v45 = vpop.f32.mrb[7].mxu1 }
 0x3a2   : > { %913 = vst [vmem:[%s1148_s4 + $0x38] sm:$0xff] %v815_v45 }
 0x3a3 PF: > { %s13_s12 = sadd.s32 1, %s996_s12  }
 0x3a4   : > { %p10_p4 = scmp.ge.s32.totalorder %s13_s12, 4  }
 0x3a6   :  { %12 = sbr.rel (!%p10_p4) target bundleno = 1 (0x1), region = 68 }

</bundles_post_ra>
